<compile_context>
chip_gen: v7x
topology: tpu7x:2x2x1
jax: 0.10.0
libtpu: 0.0.40
codegen_flags: <defaults>
</compile_context>

<pallas_src>
import functools

import jax
import jax.numpy as jnp
from jax.experimental import pallas as pl
from jax.experimental.pallas import tpu as pltpu


def _sigmoid(x):
    # One EUP op (tanh) instead of exp + reciprocal.
    return 0.5 * jnp.tanh(0.5 * x) + 0.5


def _pf_lstm_kernel(lhs_ref, c_ref, cp_ref, w_ref, b_ref, h_out_ref, c_out_ref):
    th = c_ref.shape[-1]  # hidden-units in this tile

    lhs = lhs_ref[...].astype(jnp.float32)                      # (B, K) resident
    # Single fused MXU matmul: (B, K) @ (K, 5*th) -> (B, 5*th)
    z = jnp.dot(lhs, w_ref[...].astype(jnp.float32),
                preferred_element_type=jnp.float32)
    z = z + b_ref[...].astype(jnp.float32)

    i_t   = _sigmoid(z[:, 0 * th:1 * th])
    f_t   = _sigmoid(z[:, 1 * th:2 * th])
    f_t_p = _sigmoid(z[:, 2 * th:3 * th])
    g_t   = jnp.tanh(z[:, 3 * th:4 * th])
    o_t   = _sigmoid(z[:, 4 * th:5 * th])

    c_t = (f_t * c_ref[...].astype(jnp.float32)
           + f_t_p * cp_ref[...].astype(jnp.float32)
           + i_t * g_t)
    h_out_ref[...] = (o_t * jnp.tanh(c_t)).astype(h_out_ref.dtype)
    c_out_ref[...] = c_t.astype(c_out_ref.dtype)


def pick_col_tile(input_size, hidden_size):
    """Largest lane-aligned hidden-tile whose double-buffered f32 weight block
    fits a conservative VMEM budget; falls back to full-H for small/unaligned H."""
    H = hidden_size
    K = input_size + 2 * hidden_size
    if H % 128 != 0:
        return H                       # single full-width block (e.g. the H=32 test)
    budget = 12 * 1024 * 1024          # bytes: 2 buffers x (K, 5*t) f32 weight tile
    for t in (512, 384, 256, 128):
        if H % t == 0 and 2 * (K * 5 * t * 4) <= budget:
            return t
    return 128


@functools.partial(jax.jit, static_argnames=("col_tile",))
def parent_feeding_lstm_cell(x, hidden_states, packed, *, col_tile):
    """Pallas implementation of ParentFeedingLSTMCell.forward.

    x: (B, input_size)
    hidden_states: (h_tm1, c_tm1, h_tm1_p, c_tm1_p), each (B, hidden_size)
    packed: {"W": (K, 5H) tile-interleaved, "b": (1, 5H)}   (see pack_params)
    Returns (h_t, c_t).
    """
    h_tm1, c_tm1, h_tm1_p, c_tm1_p = hidden_states
    B = x.shape[0]
    H = h_tm1.shape[-1]
    K = x.shape[-1] + 2 * H
    assert H % col_tile == 0
    n_tiles = H // col_tile

    lhs = jnp.concatenate([x, h_tm1, h_tm1_p], axis=-1)          # (B, K)

    h_t, c_t = pl.pallas_call(
        _pf_lstm_kernel,
        out_shape=(
            jax.ShapeDtypeStruct((B, H), jnp.float32),
            jax.ShapeDtypeStruct((B, H), jnp.float32),
        ),
        grid=(n_tiles,),
        in_specs=[
            pl.BlockSpec((B, K), lambda j: (0, 0)),               # [x|h|h_p], resident
            pl.BlockSpec((B, col_tile), lambda j: (0, j)),        # c_tm1 tile
            pl.BlockSpec((B, col_tile), lambda j: (0, j)),        # c_tm1_p tile
            pl.BlockSpec((K, 5 * col_tile), lambda j: (0, j)),    # packed weight tile
            pl.BlockSpec((1, 5 * col_tile), lambda j: (0, j)),    # packed bias tile
        ],
        out_specs=(
            pl.BlockSpec((B, col_tile), lambda j: (0, j)),
            pl.BlockSpec((B, col_tile), lambda j: (0, j)),
        ),
        compiler_params=pltpu.CompilerParams(
            dimension_semantics=("parallel",)),
    )(lhs, c_tm1, c_tm1_p, packed["W"], packed["b"])
    return h_t, c_t


def pack_params(raw, biases, input_size, hidden_size, col_tile):
    """Pack the 15 weight matrices + 5 biases into one (K, 5H) RHS and one
    (1, 5H) bias row, tile-interleaved as [tile][gate(i,f,f_p,c,o)][unit]."""
    b_i, b_f, b_c, b_o, b_f_p = biases
    H, I = hidden_size, input_size
    K = I + 2 * H
    zeros_hh = jnp.zeros((H, H), jnp.float32)

    def col(Wg, Ug, Upg):   # torch layout (H, in) -> stacked (K, H)
        return jnp.concatenate([Wg.T, Ug.T, Upg.T], axis=0)

    gate_cols = [
        col(raw["W_i"], raw["U_i"],  raw["U_i_p"]),   # i
        col(raw["W_f"], raw["U_f"],  zeros_hh),       # f   (no parent recurrence)
        col(raw["W_f"], zeros_hh,    raw["U_f_p"]),   # f_p (no own recurrence)
        col(raw["W_c"], raw["U_c"],  raw["U_c_p"]),   # c
        col(raw["W_o"], raw["U_o"],  raw["U_o_p"]),   # o
    ]
    W = jnp.stack(gate_cols, axis=1)                                  # (K, 5, H)
    b = jnp.stack([b_i, b_f, b_f_p, b_c, b_o], axis=0)[None, :, :]    # (1, 5, H)

    n_tiles = H // col_tile
    W = (W.reshape(K, 5, n_tiles, col_tile)
           .transpose(0, 2, 1, 3)
           .reshape(K, n_tiles * 5 * col_tile))
    b = (b.reshape(1, 5, n_tiles, col_tile)
           .transpose(0, 2, 1, 3)
           .reshape(1, n_tiles * 5 * col_tile))
    return {"W": W, "b": b}


def init_params(key, input_size, hidden_size):
    """Deterministic init matching reset_parameters(): orthogonal weights,
    zero biases except b_f / b_f_p = 1."""
    ortho = jax.nn.initializers.orthogonal()
    keys = jax.random.split(key, 12)
    names_w = ["W_i", "W_f", "W_c", "W_o"]
    names_u = ["U_i", "U_f", "U_c", "U_o"]
    names_up = ["U_i_p", "U_f_p", "U_c_p", "U_o_p"]

    raw = {}
    ki = 0
    for n in names_w:
        raw[n] = ortho(keys[ki], (hidden_size, input_size), jnp.float32); ki += 1
    for n in names_u:
        raw[n] = ortho(keys[ki], (hidden_size, hidden_size), jnp.float32); ki += 1
    for n in names_up:
        raw[n] = ortho(keys[ki], (hidden_size, hidden_size), jnp.float32); ki += 1

    b_i = jnp.zeros((hidden_size,), jnp.float32)
    b_f = jnp.ones((hidden_size,), jnp.float32)
    b_c = jnp.zeros((hidden_size,), jnp.float32)
    b_o = jnp.zeros((hidden_size,), jnp.float32)
    b_f_p = jnp.ones((hidden_size,), jnp.float32)
    biases = (b_i, b_f, b_c, b_o, b_f_p)
    return raw, biases


def _reference(x, hidden_states, raw, biases):
    """Pure-JAX reference mirroring the PyTorch forward, for verification."""
    h, c, h_p, c_p = hidden_states
    b_i, b_f, b_c, b_o, b_f_p = biases
    lin = lambda a, W: a @ W.T
    i_t = jax.nn.sigmoid(lin(x, raw["W_i"]) + lin(h, raw["U_i"]) + lin(h_p, raw["U_i_p"]) + b_i)
    xf_t = lin(x, raw["W_f"])
    f_t = jax.nn.sigmoid(xf_t + lin(h, raw["U_f"]) + b_f)
    f_t_p = jax.nn.sigmoid(xf_t + lin(h_p, raw["U_f_p"]) + b_f_p)
    xc_t = lin(x, raw["W_c"]) + lin(h, raw["U_c"]) + lin(h_p, raw["U_c_p"]) + b_c
    c_t = f_t * c + f_t_p * c_p + i_t * jnp.tanh(xc_t)
    o_t = jax.nn.sigmoid(lin(x, raw["W_o"]) + lin(h, raw["U_o"]) + lin(h_p, raw["U_o_p"]) + b_o)
    h_t = o_t * jnp.tanh(c_t)
    return h_t, c_t


if __name__ == "__main__":
    B, INPUT_SIZE, HIDDEN_SIZE = 2, 16, 32

    key = jax.random.PRNGKey(0)
    k_param, k_x, k_h, k_c, k_hp, k_cp = jax.random.split(key, 6)

    raw, biases = init_params(k_param, INPUT_SIZE, HIDDEN_SIZE)
    col_tile = pick_col_tile(INPUT_SIZE, HIDDEN_SIZE)
    packed = pack_params(raw, biases, INPUT_SIZE, HIDDEN_SIZE, col_tile)

    x = jax.random.normal(k_x, (B, INPUT_SIZE), jnp.float32)
    h_tm1 = jax.random.normal(k_h, (B, HIDDEN_SIZE), jnp.float32)
    c_tm1 = jax.random.normal(k_c, (B, HIDDEN_SIZE), jnp.float32)
    h_tm1_p = jax.random.normal(k_hp, (B, HIDDEN_SIZE), jnp.float32)
    c_tm1_p = jax.random.normal(k_cp, (B, HIDDEN_SIZE), jnp.float32)
    hidden_states = (h_tm1, c_tm1, h_tm1_p, c_tm1_p)

    h_t, c_t = parent_feeding_lstm_cell(x, hidden_states, packed, col_tile=col_tile)
    jax.block_until_ready((h_t, c_t))

    h_ref, c_ref = _reference(x, hidden_states, raw, biases)
    assert jnp.allclose(h_t, h_ref, atol=1e-4, rtol=1e-4), "h_t mismatch"
    assert jnp.allclose(c_t, c_ref, atol=1e-4, rtol=1e-4), "c_t mismatch"

    print("KERNEL_OK")
</pallas_src>

<mosaic_0001>
module attributes {stable_mosaic.version = 11 : i64} {
  func.func @_pf_lstm_kernel(%arg0: i32, %arg1: memref<2x80xf32, #tpu.memory_space<vmem>>, %arg2: memref<2x32xf32, #tpu.memory_space<vmem>>, %arg3: memref<2x32xf32, #tpu.memory_space<vmem>>, %arg4: memref<80x160xf32, #tpu.memory_space<vmem>>, %arg5: memref<1x160xf32, #tpu.memory_space<vmem>>, %arg6: memref<2x32xf32, #tpu.memory_space<vmem>>, %arg7: memref<2x32xf32, #tpu.memory_space<vmem>>) attributes {dimension_semantics = [#tpu.dimension_semantics<parallel>], iteration_bounds = array<i64: 1>, scalar_prefetch = 0 : i64, scratch_operands = 0 : i64, tpu.core_type = #tpu.core_type<tc>, window_params = [{pipeline_mode = #tpu.pipeline_mode<synchronous>, transform_indices = @transform_0, window_bounds = array<i64: 2, 80>}, {transform_indices = @transform_1, window_bounds = array<i64: 2, 32>}, {transform_indices = @transform_2, window_bounds = array<i64: 2, 32>}, {transform_indices = @transform_3, window_bounds = array<i64: 80, 160>}, {transform_indices = @transform_4, window_bounds = array<i64: 1, 160>}, {transform_indices = @transform_5, window_bounds = array<i64: 2, 32>}, {transform_indices = @transform_6, window_bounds = array<i64: 2, 32>}]} {
    %c0 = arith.constant 0 : index
    %c0_0 = arith.constant 0 : index
    %0 = vector.load %arg1[%c0, %c0_0] : memref<2x80xf32, #tpu.memory_space<vmem>>, vector<2x80xf32>
    %c0_1 = arith.constant 0 : index
    %c0_2 = arith.constant 0 : index
    %1 = vector.load %arg4[%c0_1, %c0_2] : memref<80x160xf32, #tpu.memory_space<vmem>>, vector<80x160xf32>
    %cst = arith.constant dense<0.000000e+00> : vector<2x160xf32>
    %2 = tpu.matmul %0, %1, %cst {dimension_numbers = #tpu.dot_dimension_numbers<[1], [0], [0], [1], [0, 0, 1, 1], [], []>} : vector<2x80xf32>, vector<80x160xf32>, vector<2x160xf32> -> vector<2x160xf32>
    %c0_3 = arith.constant 0 : index
    %c0_4 = arith.constant 0 : index
    %3 = vector.load %arg5[%c0_3, %c0_4] : memref<1x160xf32, #tpu.memory_space<vmem>>, vector<1x160xf32>
    %4 = vector.broadcast %3 : vector<1x160xf32> to vector<2x160xf32>
    %5 = arith.addf %2, %4 : vector<2x160xf32>
    %6 = vector.extract_strided_slice %5 {offsets = [0, 0], sizes = [2, 32], strides = [1, 1]} : vector<2x160xf32> to vector<2x32xf32>
    %cst_5 = arith.constant 5.000000e-01 : f32
    %7 = vector.broadcast %cst_5 : f32 to vector<2x32xf32>
    %8 = arith.mulf %7, %6 : vector<2x32xf32>
    %9 = math.tanh %8 : vector<2x32xf32>
    %cst_6 = arith.constant 5.000000e-01 : f32
    %10 = vector.broadcast %cst_6 : f32 to vector<2x32xf32>
    %11 = arith.mulf %10, %9 : vector<2x32xf32>
    %cst_7 = arith.constant 5.000000e-01 : f32
    %12 = vector.broadcast %cst_7 : f32 to vector<2x32xf32>
    %13 = arith.addf %11, %12 : vector<2x32xf32>
    %14 = vector.extract_strided_slice %5 {offsets = [0, 32], sizes = [2, 32], strides = [1, 1]} : vector<2x160xf32> to vector<2x32xf32>
    %cst_8 = arith.constant 5.000000e-01 : f32
    %15 = vector.broadcast %cst_8 : f32 to vector<2x32xf32>
    %16 = arith.mulf %15, %14 : vector<2x32xf32>
    %17 = math.tanh %16 : vector<2x32xf32>
    %cst_9 = arith.constant 5.000000e-01 : f32
    %18 = vector.broadcast %cst_9 : f32 to vector<2x32xf32>
    %19 = arith.mulf %18, %17 : vector<2x32xf32>
    %cst_10 = arith.constant 5.000000e-01 : f32
    %20 = vector.broadcast %cst_10 : f32 to vector<2x32xf32>
    %21 = arith.addf %19, %20 : vector<2x32xf32>
    %22 = vector.extract_strided_slice %5 {offsets = [0, 64], sizes = [2, 32], strides = [1, 1]} : vector<2x160xf32> to vector<2x32xf32>
    %cst_11 = arith.constant 5.000000e-01 : f32
    %23 = vector.broadcast %cst_11 : f32 to vector<2x32xf32>
    %24 = arith.mulf %23, %22 : vector<2x32xf32>
    %25 = math.tanh %24 : vector<2x32xf32>
    %cst_12 = arith.constant 5.000000e-01 : f32
    %26 = vector.broadcast %cst_12 : f32 to vector<2x32xf32>
    %27 = arith.mulf %26, %25 : vector<2x32xf32>
    %cst_13 = arith.constant 5.000000e-01 : f32
    %28 = vector.broadcast %cst_13 : f32 to vector<2x32xf32>
    %29 = arith.addf %27, %28 : vector<2x32xf32>
    %30 = vector.extract_strided_slice %5 {offsets = [0, 96], sizes = [2, 32], strides = [1, 1]} : vector<2x160xf32> to vector<2x32xf32>
    %31 = math.tanh %30 : vector<2x32xf32>
    %32 = vector.extract_strided_slice %5 {offsets = [0, 128], sizes = [2, 32], strides = [1, 1]} : vector<2x160xf32> to vector<2x32xf32>
    %cst_14 = arith.constant 5.000000e-01 : f32
    %33 = vector.broadcast %cst_14 : f32 to vector<2x32xf32>
    %34 = arith.mulf %33, %32 : vector<2x32xf32>
    %35 = math.tanh %34 : vector<2x32xf32>
    %cst_15 = arith.constant 5.000000e-01 : f32
    %36 = vector.broadcast %cst_15 : f32 to vector<2x32xf32>
    %37 = arith.mulf %36, %35 : vector<2x32xf32>
    %cst_16 = arith.constant 5.000000e-01 : f32
    %38 = vector.broadcast %cst_16 : f32 to vector<2x32xf32>
    %39 = arith.addf %37, %38 : vector<2x32xf32>
    %c0_17 = arith.constant 0 : index
    %c0_18 = arith.constant 0 : index
    %40 = vector.load %arg2[%c0_17, %c0_18] : memref<2x32xf32, #tpu.memory_space<vmem>>, vector<2x32xf32>
    %41 = arith.mulf %21, %40 : vector<2x32xf32>
    %c0_19 = arith.constant 0 : index
    %c0_20 = arith.constant 0 : index
    %42 = vector.load %arg3[%c0_19, %c0_20] : memref<2x32xf32, #tpu.memory_space<vmem>>, vector<2x32xf32>
    %43 = arith.mulf %29, %42 : vector<2x32xf32>
    %44 = arith.addf %41, %43 : vector<2x32xf32>
    %45 = arith.mulf %13, %31 : vector<2x32xf32>
    %46 = arith.addf %44, %45 : vector<2x32xf32>
    %47 = math.tanh %46 : vector<2x32xf32>
    %48 = arith.mulf %39, %47 : vector<2x32xf32>
    %c0_21 = arith.constant 0 : index
    %c0_22 = arith.constant 0 : index
    %49 = vector.load %arg6[%c0_21, %c0_22] : memref<2x32xf32, #tpu.memory_space<vmem>>, vector<2x32xf32>
    tpu.vector_store %arg6[%c0_21, %c0_22], %48 {strides = array<i32>} : memref<2x32xf32, #tpu.memory_space<vmem>>, vector<2x32xf32>,
    %c0_23 = arith.constant 0 : index
    %c0_24 = arith.constant 0 : index
    %50 = vector.load %arg7[%c0_23, %c0_24] : memref<2x32xf32, #tpu.memory_space<vmem>>, vector<2x32xf32>
    tpu.vector_store %arg7[%c0_23, %c0_24], %46 {strides = array<i32>} : memref<2x32xf32, #tpu.memory_space<vmem>>, vector<2x32xf32>,
    return
  }
  func.func @transform_0(%arg0: i32) -> (i32, i32) {
    %c0_i32 = arith.constant 0 : i32
    %c0_i32_0 = arith.constant 0 : i32
    %c0_i32_1 = arith.constant 0 : i32
    return %c0_i32, %c0_i32_0 : i32, i32
  }
  func.func @transform_1(%arg0: i32) -> (i32, i32) {
    %c0_i32 = arith.constant 0 : i32
    %c0_i32_0 = arith.constant 0 : i32
    return %c0_i32, %arg0 : i32, i32
  }
  func.func @transform_2(%arg0: i32) -> (i32, i32) {
    %c0_i32 = arith.constant 0 : i32
    %c0_i32_0 = arith.constant 0 : i32
    return %c0_i32, %arg0 : i32, i32
  }
  func.func @transform_3(%arg0: i32) -> (i32, i32) {
    %c0_i32 = arith.constant 0 : i32
    %c0_i32_0 = arith.constant 0 : i32
    return %c0_i32, %arg0 : i32, i32
  }
  func.func @transform_4(%arg0: i32) -> (i32, i32) {
    %c0_i32 = arith.constant 0 : i32
    %c0_i32_0 = arith.constant 0 : i32
    return %c0_i32, %arg0 : i32, i32
  }
  func.func @transform_5(%arg0: i32) -> (i32, i32) {
    %c0_i32 = arith.constant 0 : i32
    %c0_i32_0 = arith.constant 0 : i32
    return %c0_i32, %arg0 : i32, i32
  }
  func.func @transform_6(%arg0: i32) -> (i32, i32) {
    %c0_i32 = arith.constant 0 : i32
    %c0_i32_0 = arith.constant 0 : i32
    return %c0_i32, %arg0 : i32, i32
  }
}

</mosaic_0001>

<bundles_post_ra>
// kernel: parent_feeding_lstm_cell.1
= control target key start
LH: loop header
LB: loop body
LE: loop exit
PB: predicated region body
PF: predicated region fallthrough
CT: control target
= control target key end

     0   :  { %12 = vsyncpa [#allocation3], 0  ;;  %s431_s0 = inlined_call_operand.vmem [shape: f32[2,80], index: 0, kind: input, shape index: {}]   ;;  %s432_s1 = inlined_call_operand.vmem [shape: f32[2,32], index: 1, kind: input, shape index: {}]   ;;  %s433_s2 = inlined_call_operand.vmem [shape: f32[2,32], index: 2, kind: input, shape index: {}]   ;;  %s434_s3 = inlined_call_operand.hbm [shape: f32[80,160], index: 3, kind: input, shape index: {}]   ;;  %s435_s4 = inlined_call_operand.vmem [shape: f32[1,160], index: 4, kind: input, shape index: {}]   ;;  %s436_s5 = inlined_call_operand.hbm [shape: f32[2,32], index: 5, kind: output, shape index: {0}]   ;;  %s437_s6 = inlined_call_operand.hbm [shape: f32[2,32], index: 6, kind: output, shape index: {1}]  }
   0x1   :  { %13 = vsyncpa [#allocation4], 0 }
   0x2   :  { %14 = vsyncpa [#allocation7], 0  ;;  %s334_s21 = smov [#allocation2]   ;;  %s262_s25 = scalar_lea.hbm %s434_s3, 2560 }
   0x3   :  { %s26_s22 = sshll.u32 %s334_s21, 4  ;;  %p263_p0 = scmp.ne.s32.totalorder %s434_s3, %s262_s25  ;;  %s27_s22 = int_to_ptr.vmem [resolvable:$true] %s26_s22 }
   0x4   :  { %p266_p1 = scmp.lt.u32.totalorder %s262_s25, %s434_s3 }
   0x6   :  { %p268_p2 = pnand %p266_p1, %p263_p0 }
   0x8   :  { %271 = shalt.err (!%p268_p2)
}
   0x9   :  { %s272_s30 = scalar_lea.vmem %s27_s22, 2560  ;;  %p277_p4 = scmp.lt.s32.totalorder %s27_s22, %s27_s22 }
   0xa   :  { %p273_p3 = scmp.ne.s32.totalorder %s27_s22, %s272_s30  ;;  %p278_p5 = scmp.lt.s32.totalorder %s272_s30, %s272_s30 }
   0xc   :  { %p279_p6 = por %p278_p5, %p277_p4 }
   0xe   :  { %p280_p7 = pnand %p279_p6, %p273_p3 }
  0x10   :  { %283 = shalt.err (!%p280_p7)
}
  0x11   :  { %s335_s7 = smov 256   ;;  %s336_s8 = smov 16  }
  0x12   :  { %32 = dma.hbm_to_vmem [thread:$0]  %s434_s3, 2560, %s27_s22, [#allocation3], %s335_s7, %s335_s7, %s336_s8  }
  0x13   :  { %328 = dma.done.wait [#allocation3], 2560  }
  0x14   :  { %329 = vsyncadd [#allocation3], 4294964736  ;;  %v337_v0 = vmov 0.0   ;;  %v40_v1 = vld [vmem:[#allocation2 + $0x8] sm:$0xff]  ;;  %v42_v2 = vld [vmem:[#allocation2 + $0x18] sm:$0xff]  ;;  %s338_s14 = smov 64   ;;  %v61_v34 = vlaneseq }
  0x15   :  { %139 = vmatprep.mubr.f32.mxu0 %v337_v0  ;;  %v39_v3 = vld [vmem:[#allocation2] sm:$0xff]  ;;  %v225_v4 = vpack.c.bf16 %v42_v2, %v40_v1  ;;  %v41_v5 = vld [vmem:[#allocation2 + $0x10] sm:$0xff]  ;;  %v44_v6 = vld [vmem:[#allocation2 + $0x28] sm:$0xff]  ;;  %s339_s15 = smov 32   ;;  %vm71_vm0 = vcmask 654336   ;;  %vm188_vm1 = vcmask 254976  }
  0x16   :  { %v46_v7 = vld [vmem:[#allocation2 + $0x38] sm:$0xff]  ;;  %v227_v8 = vpack.c.bf16 %v41_v5, %v39_v3  ;;  %v43_v10 = vld [vmem:[#allocation2 + $0x20] sm:$0xff]  ;;  %v45_v11 = vld [vmem:[#allocation2 + $0x30] sm:$0xff]  ;;  %v62_v35 = vshrl.u32 %v61_v34, 7 }
  0x17   :  { %v229_v9 = vpack.c.bf16 %v46_v7, %v44_v6  ;;  %v48_v12 = vld [vmem:[#allocation2 + $0x48] sm:$0xff]  ;;  %226 = vmatprep.subr.bf16.mxu0 %v225_v4  ;;  %v50_v13 = vld [vmem:[#allocation2 + $0x58] sm:$0xff]  ;;  %v231_v14 = vpack.c.bf16 %v45_v11, %v43_v10  ;;  %v47_v16 = vld [vmem:[#allocation2 + $0x40] sm:$0xff] }
  0x18   :  { %228 = vmatpush1.bf16.msra.mxu0 %v227_v8  ;;  %v233_v15 = vpack.c.bf16 %v50_v13, %v48_v12  ;;  %v49_v17 = vld [vmem:[#allocation2 + $0x50] sm:$0xff]  ;;  %v52_v18 = vld [vmem:[#allocation2 + $0x68] sm:$0xff]  ;;  %v54_v19 = vld [vmem:[#allocation2 + $0x78] sm:$0xff]  ;;  %v63_v36 = vsub.s32 0, %v62_v35  ;;  %v67_v58 = vsub.s32 1, %v62_v35 }
  0x19   :  { %230 = vmatprep.subr.bf16.mxu0 %v229_v9  ;;  %v161_v20 = vld [vmem:[%s433_s2] sm:$0x3]  ;;  %v235_v22 = vpack.c.bf16 %v49_v17, %v47_v16  ;;  %v237_v23 = vpack.c.bf16 %v54_v19, %v52_v18  ;;  %v53_v25 = vld [vmem:[#allocation2 + $0x70] sm:$0xff]  ;;  %v56_v26 = vld [vmem:[#allocation2 + $0x88] sm:$0xff] }
  0x1a   :  { %v155_v21 = vld [vmem:[%s432_s1] sm:$0x3]  ;;  %163 = vrot.lane.b32.xlu0 %v161_v20, %s338_s14  ;;  %v58_v27 = vld [vmem:[#allocation2 + $0x98] sm:$0xff]  ;;  %v57_v31 = vld [vmem:[#allocation2 + $0x90] sm:$0xff] }
  0x1b   :  { %v51_v24 = vld [vmem:[#allocation2 + $0x60] sm:$0xff]  ;;  %157 = vrot.lane.b32.xlu1 %v155_v21, %s339_s15  ;;  %v241_v29 = vpack.c.bf16 %v58_v27, %v56_v26 }
  0x1c   :  { %232 = vmatpush1.bf16.msra.mxu0 %v231_v14  ;;  %v239_v28 = vpack.c.bf16 %v53_v25, %v51_v24  ;;  %v55_v30 = vld [vmem:[#allocation2 + $0x80] sm:$0xff] }
  0x1d   :  { %234 = vmatprep.subr.bf16.mxu0 %v233_v15  ;;  %v243_v32 = vpack.c.bf16 %v57_v31, %v55_v30  ;;  %v38_v33 = vld [vmem:[%s431_s0] sm:$0x3]  ;;  %s340_s0 = smov 96  }
  0x1e   :  { %v59_v37 = vld [vmem:[%s435_s4] sm:$0x3]  ;;  %s341_s4 = smov [#allocation6]  }
  0x1f   :  { %v64_v38 = vrot.slane %v59_v37, %v63_v36  ;;  %v68_v59 = vrot.slane %v59_v37, %v67_v58  ;;  %s211_s18 = sshll.u32 %s341_s4, 4  ;;  %s212_s18 = int_to_ptr.vmem [resolvable:$true] %s211_s18 }
  0x20   :  { %236 = vmatpush1.bf16.msra.mxu0 %v235_v22  ;;  %s284_s19 = scalar_lea.vmem %s212_s18, 32  ;;  %p289_p9 = scmp.lt.s32.totalorder %s212_s18, %s212_s18 }
  0x21   :  { %238 = vmatprep.subr.bf16.mxu0 %v237_v23  ;;  %p285_p8 = scmp.ne.s32.totalorder %s212_s18, %s284_s19  ;;  %p290_p10 = scmp.lt.s32.totalorder %s284_s19, %s284_s19 }
  0x23   :  { %p291_p11 = por %p290_p10, %p289_p9 }
  0x24   :  { %240 = vmatpush1.bf16.msra.mxu0 %v239_v28 }
  0x25   :  { %242 = vmatprep.subr.bf16.mxu0 %v241_v29  ;;  %p292_p12 = pnand %p291_p11, %p285_p8 }
  0x28   :  { %244 = vmatpush1.bf16.msra.mxu0 %v243_v32 }
  0x2b   :  { %224 = vmatmul.mubr.msk.f32.vlgmr.msra.gmra.mrb[0].mxu0 %vm71_vm0, %v38_v33 }
  0x8c   :  { %v164_v46 = vpop.permute.xlu0 %163 }
  0x8d   :  { %v158_v51 = vpop.permute.xlu1 %157 }
  0xfe   :  { %v141_v39 = vpop.f32.mrb[0].mxu0 }
  0xff   :  { %v142_v40 = vadd.f32 %v141_v39, %v64_v38  ;;  %v143_v41 = vpop.f32.mrb[1].mxu0 }
 0x100   :  { %v144_v60 = vadd.f32 %v143_v41, %v68_v59 }
 0x101   :  { %v146_v42 = vmul.f32 0.5, %v142_v40  ;;  %254 = vtanh.f32 %v142_v40 }
 0x102   :  { %v151_v61 = vmul.f32 0.5, %v144_v60 }
 0x103   :  { %256 = vtanh.f32 %v146_v42 }
 0x10b   :  { %v255_v43 = vpop.eup %254 }
 0x10c   :  { %173 = vrot.lane.b32.xlu0 %v255_v43, %s339_s15 }
 0x10d   :  { %v257_v44 = vpop.eup %256 }
 0x10e   :  { %v148_v45 = vmul.f32 0.5, %v257_v44 }
 0x110   :  { %v149_v47 = vadd.f32 0.5, %v148_v45 }
 0x112   :  { %v166_v48 = vmul.f32 %v164_v46, %v149_v47  ;;  %v160_v53 = vmul.f32 %v158_v51, %v149_v47 }
 0x114   :  { %168 = vrot.lane.b32.xlu1 %v166_v48, %s340_s0 }
 0x17e   :  { %v174_v49 = vpop.permute.xlu0 %173 }
 0x17f   :  { %v176_v50 = vmul.f32 %v174_v49, %v149_v47 }
 0x181   :  { %178 = vrot.lane.b32.xlu0 %v176_v50, %s339_s15 }
 0x186   :  { %v169_v52 = vpop.permute.xlu1 %168 }
 0x187   :  { %v171_v54 = vadd.f32 %v169_v52, %v160_v53 }
 0x1f3   :  { %v179_v55 = vpop.permute.xlu0 %178 }
 0x1f4   :  { %v181_v56 = vadd.f32 %v179_v55, %v171_v54 }
 0x1f6   :  { %258 = vtanh.f32 %v181_v56  ;;  %191 = vrot.lane.b32.xlu0 %v181_v56, %s340_s0 }
 0x1f7   :  { %260 = vtanh.f32 %v151_v61 }
 0x200   :  { %v259_v57 = vpop.eup %258 }
 0x201   :  { %184 = vrot.lane.b32.xlu1 %v259_v57, %s340_s0 }
 0x268   :  { %v192_v62 = vpop.permute.xlu0 %191 }
 0x269   :  { %194 = vst.msk [vmem:[#allocation6] sm:$0x3] %vm188_vm1, %v192_v62 }
 0x26a   :  { %295 = shalt.err (!%p292_p12)
}
 0x26b   :  { %s296_s22 = scalar_lea.hbm %s437_s6, 32 }
 0x26c   :  { %p297_p13 = scmp.ne.s32.totalorder %s437_s6, %s296_s22  ;;  %p300_p0 = scmp.lt.u32.totalorder %s296_s22, %s437_s6 }
 0x26e   :  { %p302_p1 = pnand %p300_p0, %p297_p13 }
 0x270   :  { %305 = shalt.err (!%p302_p1)
}
 0x271   :  { %214 = dma.vmem_to_hbm [thread:$0]  %s212_s18, 32, %s437_s6, [#allocation7]   ;;  %v261_v63 = vpop.eup %260 }
 0x272   :  { %v153_v0 = vmul.f32 0.5, %v261_v63  ;;  %s342_s29 = smov [#allocation5]  }
 0x273   :  { %s201_s30 = sshll.u32 %s342_s29, 4  ;;  %v185_v2 = vpop.permute.xlu1 %184  ;;  %s202_s30 = int_to_ptr.vmem [resolvable:$true] %s201_s30 }
 0x274   :  { %v154_v1 = vadd.f32 0.5, %v153_v0  ;;  %s306_s7 = scalar_lea.vmem %s202_s30, 32  ;;  %p311_p3 = scmp.lt.s32.totalorder %s202_s30, %s202_s30 }
 0x275   :  { %p307_p2 = scmp.ne.s32.totalorder %s202_s30, %s306_s7  ;;  %p312_p4 = scmp.lt.s32.totalorder %s306_s7, %s306_s7 }
 0x276   :  { %v187_v3 = vmul.f32 %v185_v2, %v154_v1 }
 0x277   :  { %p313_p5 = por %p312_p4, %p311_p3 }
 0x278   :  { %189 = vst.msk [vmem:[#allocation5] sm:$0x3] %vm188_vm1, %v187_v3 }
 0x279   :  { %p314_p6 = pnand %p313_p5, %p307_p2 }
 0x27b   :  { %317 = shalt.err (!%p314_p6)
}
 0x27c   :  { %s318_s6 = scalar_lea.hbm %s436_s5, 32 }
 0x27d   :  { %p319_p7 = scmp.ne.s32.totalorder %s436_s5, %s318_s6  ;;  %p322_p8 = scmp.lt.u32.totalorder %s318_s6, %s436_s5 }
 0x27f   :  { %p324_p9 = pnand %p322_p8, %p319_p7 }
 0x281   :  { %327 = shalt.err (!%p324_p9)
}
 0x282   :  { %204 = dma.vmem_to_hbm [thread:$0]  %s202_s30, 32, %s436_s5, [#allocation4]  }
 0x283   :  { %330 = dma.done.wait [#allocation4], 32  }
 0x284   :  { %331 = vsyncadd [#allocation4], 4294967264 }
 0x285   :  { %332 = dma.done.wait [#allocation7], 32  }
 0x286   :  { %333 = vsyncadd [#allocation7], 4294967264 }
 0x287   :  { %221 = vsyncpa [#allocation3], 1 }
 0x288   :  { %222 = vsyncpa [#allocation4], 1 }
 0x289   :  { %223 = vsyncpa [#allocation7], 1 }

</bundles_post_ra>
